<compile_context>
chip_gen: v7x
topology: tpu7x:2x2x1
jax: 0.10.0
libtpu: 0.0.40
codegen_flags: <defaults>
</compile_context>

<pallas_src>
import functools

import jax
import jax.numpy as jnp
from jax.experimental import pallas as pl
from jax.experimental.pallas import tpu as pltpu


def _round_up(v: int, m: int) -> int:
    return -(-v // m) * m


def _fm_kernel(x_ref, o_ref, *, num_fields, embed_dim, reduce_sum):
    F, E = num_fields, embed_dim
    # Fused single-pass field reduction over the flattened (tb, F*E) block:
    # slice each field's lane range, upcast to f32 as it is consumed, and
    # accumulate sum and sum-of-squares in one traversal (static unroll over F).
    x0 = x_ref[:, 0:E].astype(jnp.float32)
    s = x0
    sq = x0 * x0
    for f in range(1, F):
        xf = x_ref[:, f * E:(f + 1) * E].astype(jnp.float32)
        s = s + xf
        sq = sq + xf * xf
    ix = s * s - sq                                      # (tb, E)  f32
    if reduce_sum:
        out = 0.5 * jnp.sum(ix, axis=1, keepdims=True)   # (tb, 1)
    else:
        out = 0.5 * ix                                    # (tb, E)
    o_ref[...] = out.astype(o_ref.dtype)


def factorization_machine(x: jax.Array, reduce_sum: bool = True, *,
                          block_rows: int | None = None,
                          block_budget_bytes: int = 12 << 20) -> jax.Array:
    """x: (batch, num_fields, embed_dim). Returns (batch, 1) if reduce_sum else (batch, embed_dim)."""
    B, F, E = x.shape
    FE = F * E
    out_dtype = x.dtype
    in_isz = jnp.dtype(x.dtype).itemsize
    out_isz = jnp.dtype(out_dtype).itemsize
    out_cols = 1 if reduce_sum else E

    # ---- batch-tile sizing from the *padded* VMEM footprint -----------------
    lane_fe = _round_up(FE, 128)            # lane dim rounds up to 128 in VMEM
    lane_e = _round_up(E, 128)
    in_row = lane_fe * in_isz               # input block bytes per batch row (per buffer)
    acc_row = 2 * lane_e * 4                # f32 sum / sum-of-squares accumulators
    ix_row = lane_e * 4                     # ix temporary
    out_row = (128 * out_isz) if reduce_sum else (lane_e * out_isz)
    per_row = 2 * in_row + acc_row + ix_row + 2 * out_row   # x2: pipeline double buffers

    if block_rows is not None:
        tb = max(8, _round_up(block_rows, 8))
    else:
        tb = max(8, (block_budget_bytes // per_row) // 8 * 8)
        tb = min(tb, 1024)                  # >=512-row tiles already sit near the HBM roofline

    if tb >= B:
        if B >= 256:
            # Enough work to matter: force >=2 grid steps so DMA/compute overlap
            # and both v7x TensorCores get a share of the batch.
            tb = max(8, _round_up(-(-B // 2), 8))
        else:
            tb = B                          # tiny batch: single full-array block
    pad_b = (-B) % tb
    Bp = B + pad_b
    grid = (Bp // tb,)

    x2 = x.reshape(B, FE)                   # free: contiguous reshape
    if pad_b:
        # Zero batch rows produce zero FM output; sliced off below.
        x2 = jnp.pad(x2, ((0, pad_b), (0, 0)))

    kernel = functools.partial(_fm_kernel, num_fields=F, embed_dim=E,
                               reduce_sum=reduce_sum)

    n = Bp * FE
    cost = pl.CostEstimate(
        flops=4 * n,                         # s += x, sq += x*x, s*s - sq, final reduce
        transcendentals=0,
        bytes_accessed=n * in_isz + Bp * out_cols * out_isz,
    )

    out = pl.pallas_call(
        kernel,
        out_shape=jax.ShapeDtypeStruct((Bp, out_cols), out_dtype),
        grid_spec=pltpu.PrefetchScalarGridSpec(
            num_scalar_prefetch=0,
            grid=grid,
            in_specs=[pl.BlockSpec((tb, FE), lambda i: (i, 0))],
            out_specs=pl.BlockSpec((tb, out_cols), lambda i: (i, 0)),
        ),
        compiler_params=pltpu.CompilerParams(
            dimension_semantics=("parallel",),
            vmem_limit_bytes=32 << 20,       # block data ~<=12 MiB; safe on v5e/v6e/v7x
        ),
        cost_estimate=cost,
    )(x2)

    return out[:B]


if __name__ == "__main__":
    def ref_fm(xx, reduce_sum=True):
        s = jnp.sum(xx, axis=1)
        ix = s * s - jnp.sum(xx * xx, axis=1)
        if reduce_sum:
            return 0.5 * jnp.sum(ix, axis=1, keepdims=True)
        return 0.5 * ix

    key = jax.random.PRNGKey(0)
    B, F, E = 2, 4, 32
    x = jax.random.normal(key, (B, F, E), dtype=jnp.float32)

    # reduce_sum=True (module default): output (B, 1)
    out = jax.block_until_ready(factorization_machine(x, reduce_sum=True))
    assert out.shape == (B, 1), out.shape
    assert jnp.allclose(out, ref_fm(x, True), rtol=1e-5, atol=1e-5)

    # reduce_sum=False path: output (B, E)
    out2 = jax.block_until_ready(factorization_machine(x, reduce_sum=False))
    assert out2.shape == (B, E), out2.shape
    assert jnp.allclose(out2, ref_fm(x, False), rtol=1e-5, atol=1e-5)

    # Multi-block, zero-padded batch path (forced small tile -> 4 grid steps).
    B2 = 200
    xb = jax.random.normal(jax.random.PRNGKey(1), (B2, F, E), dtype=jnp.float32)
    out3 = jax.block_until_ready(
        factorization_machine(xb, reduce_sum=True, block_rows=64))
    assert out3.shape == (B2, 1), out3.shape
    assert jnp.allclose(out3, ref_fm(xb, True), rtol=1e-5, atol=1e-4)

    print("KERNEL_OK")
</pallas_src>

<mosaic_0001>
module attributes {stable_mosaic.version = 11 : i64} {
  func.func @_fm_kernel(%arg0: i32, %arg1: memref<2x128xf32, #tpu.memory_space<vmem>>, %arg2: memref<2x1xf32, #tpu.memory_space<vmem>>) attributes {dimension_semantics = [#tpu.dimension_semantics<parallel>], iteration_bounds = array<i64: 1>, scalar_prefetch = 0 : i64, scratch_operands = 0 : i64, tpu.core_type = #tpu.core_type<tc>, window_params = [{transform_indices = @transform_0, window_bounds = array<i64: 2, 128>}, {transform_indices = @transform_1, window_bounds = array<i64: 2, 1>}]} {
    %c0 = arith.constant 0 : index
    %c0_0 = arith.constant 0 : index
    %0 = vector.load %arg1[%c0, %c0_0] : memref<2x128xf32, #tpu.memory_space<vmem>>, vector<2x32xf32>
    %1 = arith.mulf %0, %0 : vector<2x32xf32>
    %c0_1 = arith.constant 0 : index
    %c32 = arith.constant 32 : index
    %2 = vector.load %arg1[%c0_1, %c32] : memref<2x128xf32, #tpu.memory_space<vmem>>, vector<2x32xf32>
    %3 = arith.addf %0, %2 : vector<2x32xf32>
    %4 = arith.mulf %2, %2 : vector<2x32xf32>
    %5 = arith.addf %1, %4 : vector<2x32xf32>
    %c0_2 = arith.constant 0 : index
    %c64 = arith.constant 64 : index
    %6 = vector.load %arg1[%c0_2, %c64] : memref<2x128xf32, #tpu.memory_space<vmem>>, vector<2x32xf32>
    %7 = arith.addf %3, %6 : vector<2x32xf32>
    %8 = arith.mulf %6, %6 : vector<2x32xf32>
    %9 = arith.addf %5, %8 : vector<2x32xf32>
    %c0_3 = arith.constant 0 : index
    %c96 = arith.constant 96 : index
    %10 = vector.load %arg1[%c0_3, %c96] : memref<2x128xf32, #tpu.memory_space<vmem>>, vector<2x32xf32>
    %11 = arith.addf %7, %10 : vector<2x32xf32>
    %12 = arith.mulf %10, %10 : vector<2x32xf32>
    %13 = arith.addf %9, %12 : vector<2x32xf32>
    %14 = arith.mulf %11, %11 : vector<2x32xf32>
    %15 = arith.subf %14, %13 : vector<2x32xf32>
    %cst = arith.constant dense<0.000000e+00> : vector<2xf32>
    %16 = vector.multi_reduction <add>, %15, %cst [1] : vector<2x32xf32> to vector<2xf32>
    %17 = vector.shape_cast %16 : vector<2xf32> to vector<2x1xf32>
    %cst_4 = arith.constant 5.000000e-01 : f32
    %18 = vector.broadcast %cst_4 : f32 to vector<2x1xf32>
    %19 = arith.mulf %18, %17 : vector<2x1xf32>
    %c0_5 = arith.constant 0 : index
    %c0_6 = arith.constant 0 : index
    %20 = vector.load %arg2[%c0_5, %c0_6] : memref<2x1xf32, #tpu.memory_space<vmem>>, vector<2x1xf32>
    tpu.vector_store %arg2[%c0_5, %c0_6], %19 {strides = array<i32>} : memref<2x1xf32, #tpu.memory_space<vmem>>, vector<2x1xf32>,
    return
  }
  func.func @transform_0(%arg0: i32) -> (i32, i32) {
    %c0_i32 = arith.constant 0 : i32
    %c0_i32_0 = arith.constant 0 : i32
    return %arg0, %c0_i32 : i32, i32
  }
  func.func @transform_1(%arg0: i32) -> (i32, i32) {
    %c0_i32 = arith.constant 0 : i32
    %c0_i32_0 = arith.constant 0 : i32
    return %arg0, %c0_i32 : i32, i32
  }
}

</mosaic_0001>

<bundles_post_ra>
// kernel: tpu_custom_call.1
= control target key start
LH: loop header
LB: loop body
LE: loop exit
PB: predicated region body
PF: predicated region fallthrough
CT: control target
= control target key end

     0   :  { %6 = vsyncpa [#allocation3], 0  ;;  %s90_s6 = smov [#allocation2]   ;;  %s119_s0 = inlined_call_operand.hbm [shape: f32[2,128], index: 0, kind: input, shape index: {}]   ;;  %s120_s1 = inlined_call_operand.vmem [shape: f32[2,1], index: 1, kind: output, shape index: {}]  }
   0x1   :  { %s13_s7 = sshll.u32 %s90_s6, 4  ;;  %s66_s10 = scalar_lea.hbm %s119_s0, 32  ;;  %s14_s7 = int_to_ptr.vmem [resolvable:$true] %s13_s7 }
   0x2   :  { %p67_p0 = scmp.ne.s32.totalorder %s119_s0, %s66_s10  ;;  %p70_p1 = scmp.lt.u32.totalorder %s66_s10, %s119_s0 }
   0x4   :  { %p72_p2 = pnand %p70_p1, %p67_p0 }
   0x6   :  { %75 = shalt.err (!%p72_p2)
}
   0x7   :  { %s76_s15 = scalar_lea.vmem %s14_s7, 32  ;;  %p81_p4 = scmp.lt.s32.totalorder %s14_s7, %s14_s7 }
   0x8   :  { %p77_p3 = scmp.ne.s32.totalorder %s14_s7, %s76_s15  ;;  %p82_p5 = scmp.lt.s32.totalorder %s76_s15, %s76_s15 }
   0xa   :  { %p83_p6 = por %p82_p5, %p81_p4 }
   0xc   :  { %p84_p7 = pnand %p83_p6, %p77_p3 }
   0xe   :  { %87 = shalt.err (!%p84_p7)
}
   0xf   :  { %16 = dma.hbm_to_vmem [thread:$0]  %s119_s0, 32, %s14_s7, [#allocation3]  }
  0x10   :  { %88 = dma.done.wait [#allocation3], 32  }
  0x11   :  { %89 = vsyncadd [#allocation3], 4294967264  ;;  %v20_v0 = vld [vmem:[#allocation2] sm:$0x3]  ;;  %s91_s18 = smov 64   ;;  %s92_s19 = smov 96  }
  0x12   :  { %32 = vrot.lane.b32.xlu1 %v20_v0, %s91_s18  ;;  %23 = vrot.lane.b32.xlu0 %v20_v0, %s92_s19  ;;  %v21_v1 = vmul.f32 %v20_v0, %v20_v0  ;;  %s93_s20 = smov 32   ;;  %vm50_vm0 = vcmask 254976   ;;  %vm55_vm1 = vcmask 1024  }
  0x16   :  { %36 = vrot.lane.b32.xlu1 %v21_v1, %s91_s18  ;;  %28 = vrot.lane.b32.xlu0 %v21_v1, %s92_s19 }
  0x1a   :  { %44 = vrot.lane.b32.xlu1 %v21_v1, %s93_s20  ;;  %40 = vrot.lane.b32.xlu0 %v20_v0, %s93_s20 }
  0x84   :  { %v33_v2 = vpop.permute.xlu1 %32  ;;  %v24_v3 = vpop.permute.xlu0 %23 }
  0x85   :  { %v26_v4 = vadd.f32 %v24_v3, %v20_v0 }
  0x87   :  { %v35_v9 = vadd.f32 %v33_v2, %v26_v4 }
  0x88   :  { %v37_v5 = vpop.permute.xlu1 %36  ;;  %v29_v6 = vpop.permute.xlu0 %28 }
  0x89   :  { %v31_v7 = vadd.f32 %v29_v6, %v21_v1 }
  0x8b   :  { %v39_v8 = vadd.f32 %v37_v5, %v31_v7 }
  0x8c   :  { %v45_v10 = vpop.permute.xlu1 %44  ;;  %v41_v11 = vpop.permute.xlu0 %40 }
  0x8d   :  { %v43_v12 = vadd.f32 %v41_v11, %v35_v9  ;;  %v47_v13 = vadd.f32 %v45_v10, %v39_v8 }
  0x8f   :  { %v48_v14 = vmul.f32 %v43_v12, %v43_v12 }
  0x91   :  { %v49_v15 = vsub.f32 %v48_v14, %v47_v13 }
  0x93   :  { %v51_v16 = vsel %vm50_vm0, %v49_v15, 0.0 }
  0x94   :  { %52 = vadd.xlane.f32.xlu0 %v51_v16 }
 0x121   :  { %v53_v17 = vpop.xlane.xlu0 %52 }
 0x122   :  { %v54_v18 = vmul.f32 0.5, %v53_v17 }
 0x124   :  { %56 = vst.msk [vmem:[%s120_s1] sm:$0x3] %vm55_vm1, %v54_v18 }
 0x125   :  { %61 = vsyncpa [#allocation3], 1 }

</bundles_post_ra>
